<compile_context>
chip_gen: v7x
topology: tpu7x:2x2x1
jax: 0.10.0
libtpu: 0.0.40
codegen_flags: <defaults>
</compile_context>

<pallas_src>
import functools

import jax
import jax.numpy as jnp
from jax.experimental import pallas as pl
from jax.experimental.pallas import tpu as pltpu


def _vmem_capacity_bytes():
    """VMEM capacity of the local TPU; falls back to the v7x 64 MiB floor."""
    try:
        return int(pltpu.get_tpu_info().vmem_capacity_bytes)
    except Exception:
        return 64 << 20


def _ce_kernel(logits_ref, tgt_ref, out_ref, *, pad_id, n_rows, row_tile):
    x = logits_ref[...]                                   # (TR, V) input dtype
    t = tgt_ref[...]                                      # (TR, 1) int32

    # Mask pad targets and the ragged row tail of the last (partial) tile.
    row0 = pl.program_id(0) * row_tile
    row = row0 + jax.lax.broadcasted_iota(jnp.int32, t.shape, 0)
    valid = (t != pad_id) & (row < n_rows)                # (TR, 1) bool

    # Row max and one-hot target gather in the input dtype (exact in bf16);
    # the select stays inside the sum so no (TR, V) temp needs to persist.
    m = jnp.max(x, axis=-1, keepdims=True).astype(jnp.float32)        # (TR, 1)
    col = jax.lax.broadcasted_iota(jnp.int32, (1, x.shape[1]), 1)     # (1, V)
    zero = jnp.zeros((), dtype=x.dtype)
    tgt_logit = jnp.sum(jnp.where(col == t, x, zero),
                        axis=-1, keepdims=True).astype(jnp.float32)   # (TR, 1)

    # Numerically stable log-sum-exp: upcast to f32 only inside the exp path,
    # keeping the subtraction in f32.
    sumexp = jnp.sum(jnp.exp(x.astype(jnp.float32) - m),
                     axis=-1, keepdims=True)                          # (TR, 1)
    loss = jnp.log(sumexp) + m - tgt_logit                            # (TR, 1)

    # Per-tile partial sum of the masked per-row losses (sublane reduce, XLU).
    tile_sum = jnp.sum(jnp.where(valid, loss, 0.0), axis=0, keepdims=True)
    out_ref[...] = jnp.broadcast_to(tile_sum.reshape(1, 1, 1), out_ref.shape)


def cross_entropy_loss(logits, targets, pad_id, *, row_tile=None,
                       vmem_budget_bytes=None):
    """Matches torch.nn.CrossEntropyLoss(reduction='mean', ignore_index=pad_id)
    applied to logits.view(-1, V) and targets.view(-1)."""
    V = logits.shape[-1]
    x = logits.reshape(-1, V)                              # keep HBM dtype
    t = targets.reshape(-1).astype(jnp.int32)
    N = x.shape[0]

    itemsize = jnp.dtype(x.dtype).itemsize
    gran = 16 if itemsize < 4 else 8                       # bf16 sublane packing

    cap = _vmem_capacity_bytes()
    if vmem_budget_bytes is None:
        # v5e/v6e have 128 MiB VMEM -> bigger working set; v7x only 64 MiB/core.
        vmem_budget_bytes = (80 << 20) if cap >= (96 << 20) else (40 << 20)

    if row_tile is None:
        # Working-set per row: 2x double-buffered input rows + ~2 f32-sized
        # temporaries for the exp/sum path, plus small per-row outputs.
        bytes_per_row = V * (2 * itemsize + 2 * 4) + 128
        cand = max(gran, (vmem_budget_bytes // bytes_per_row) // gran * gran)
        cand = min(cand, 2048)                             # bound live ranges
        # Keep >= 2 grid blocks when possible so both TensorCores get work.
        half = (((N + 1) // 2) + gran - 1) // gran * gran
        row_tile = int(max(gran, min(cand, half)))
    else:
        row_tile = max(gran, (int(row_tile) // gran) * gran)

    grid = (N + row_tile - 1) // row_tile
    t2 = t.reshape(-1, 1)

    # Size the VMEM limit against what is actually materialized.
    block_in_bytes = row_tile * V * itemsize
    need = 2 * block_in_bytes + 2 * row_tile * V * 4 + (2 << 20)
    vmem_limit = int(min(max(need, 32 << 20), int(cap * 0.85)))

    kernel = functools.partial(_ce_kernel, pad_id=int(pad_id), n_rows=N,
                               row_tile=row_tile)

    partials = pl.pallas_call(
        kernel,
        out_shape=jax.ShapeDtypeStruct((grid, 1, 128), jnp.float32),
        grid_spec=pltpu.PrefetchScalarGridSpec(
            num_scalar_prefetch=0,
            grid=(grid,),
            in_specs=[
                # Last block dim == full vocab dim (legal even when ragged),
                # second-to-last a multiple of 8/16 -> dense DMA, no HBM pad.
                pl.BlockSpec((row_tile, V), lambda i: (i, 0)),
                pl.BlockSpec((row_tile, 1), lambda i: (i, 0)),
            ],
            out_specs=pl.BlockSpec((1, 1, 128), lambda i: (i, 0, 0)),
        ),
        compiler_params=pltpu.CompilerParams(
            dimension_semantics=("parallel",),     # shard tiles across TCs
            vmem_limit_bytes=vmem_limit,
        ),
    )(x, t2)

    total = jnp.sum(partials[:, 0, 0])                     # f32 sum of tile sums
    count = jnp.sum(t != pad_id)                           # exact int token count
    # Mean over non-ignored tokens (NaN if all ignored, same as PyTorch).
    return (total / count.astype(jnp.float32)).astype(jnp.float32)


def _reference(logits, targets, pad_id):
    V = logits.shape[-1]
    x = logits.reshape(-1, V).astype(jnp.float32)
    t = targets.reshape(-1).astype(jnp.int32)
    logp = jax.nn.log_softmax(x, axis=-1)
    nll = -jnp.take_along_axis(logp, t[:, None], axis=-1)[:, 0]
    valid = (t != pad_id)
    return jnp.sum(jnp.where(valid, nll, 0.0)) / jnp.sum(valid.astype(jnp.float32))


if __name__ == "__main__":
    key = jax.random.PRNGKey(0)
    pad_id = 0

    # case 1: f32 logits, nicely shaped (grid of 2, both tiles full)
    B, S, V = 2, 8, 32
    k1, k2 = jax.random.split(key)
    logits = jax.random.normal(k1, (B, S, V), dtype=jnp.float32)
    targets = jax.random.randint(k2, (B, S), 0, V, dtype=jnp.int32)
    targets = targets.at[0, 0].set(pad_id).at[1, 3].set(pad_id)  # hit ignore_index
    loss = cross_entropy_loss(logits, targets, pad_id)
    jax.block_until_ready(loss)
    ref = _reference(logits, targets, pad_id)
    assert jnp.allclose(loss, ref, atol=1e-5, rtol=1e-5), (loss, ref)

    # case 2: bf16 logits, odd V and odd N (ragged lanes + ragged row tail)
    B2, S2, V2 = 2, 7, 33
    k3, k4 = jax.random.split(k1)
    logits2 = jax.random.normal(k3, (B2, S2, V2), dtype=jnp.bfloat16)
    targets2 = jax.random.randint(k4, (B2, S2), 0, V2, dtype=jnp.int32)
    targets2 = targets2.at[0, 2].set(pad_id)
    loss2 = cross_entropy_loss(logits2, targets2, pad_id)
    jax.block_until_ready(loss2)
    ref2 = _reference(logits2, targets2, pad_id)
    assert jnp.allclose(loss2, ref2, atol=1e-4, rtol=1e-4), (loss2, ref2)

    # case 3: f32 logits, V > 128 and ragged, multi-tile grid with partial tail
    B3, S3, V3 = 1, 15, 257
    k5, k6 = jax.random.split(k3)
    logits3 = jax.random.normal(k5, (B3, S3, V3), dtype=jnp.float32)
    targets3 = jax.random.randint(k6, (B3, S3), 0, V3, dtype=jnp.int32)
    targets3 = targets3.at[0, 5].set(pad_id)
    loss3 = cross_entropy_loss(logits3, targets3, pad_id)
    jax.block_until_ready(loss3)
    ref3 = _reference(logits3, targets3, pad_id)
    assert jnp.allclose(loss3, ref3, atol=1e-5, rtol=1e-5), (loss3, ref3)

    print("KERNEL_OK")
</pallas_src>

<mosaic_0001>
module attributes {stable_mosaic.version = 11 : i64} {
  func.func @_ce_kernel(%arg0: i32, %arg1: memref<8x32xf32, #tpu.memory_space<vmem>>, %arg2: memref<8x1xi32, #tpu.memory_space<vmem>>, %arg3: memref<1x1x128xf32, #tpu.memory_space<vmem>>) attributes {dimension_semantics = [#tpu.dimension_semantics<parallel>], iteration_bounds = array<i64: 2>, scalar_prefetch = 0 : i64, scratch_operands = 0 : i64, tpu.core_type = #tpu.core_type<tc>, window_params = [{transform_indices = @transform_0, window_bounds = array<i64: 8, 32>}, {transform_indices = @transform_1, window_bounds = array<i64: 8, 1>}, {transform_indices = @transform_2, window_bounds = array<i64: 1, 1, 128>}]} {
    %c0 = arith.constant 0 : index
    %c0_0 = arith.constant 0 : index
    %0 = vector.load %arg1[%c0, %c0_0] : memref<8x32xf32, #tpu.memory_space<vmem>>, vector<8x32xf32>
    %c0_1 = arith.constant 0 : index
    %c0_2 = arith.constant 0 : index
    %1 = vector.load %arg2[%c0_1, %c0_2] : memref<8x1xi32, #tpu.memory_space<vmem>>, vector<8x1xi32>
    %c8_i32 = arith.constant 8 : i32
    %2 = arith.muli %arg0, %c8_i32 : i32
    %3 = tpu.iota {dimensions = array<i32: 0>} : vector<8x1xi32>
    %4 = vector.broadcast %2 : i32 to vector<8x1xi32>
    %5 = arith.addi %4, %3 : vector<8x1xi32>
    %c0_i32 = arith.constant 0 : i32
    %6 = vector.broadcast %c0_i32 : i32 to vector<8x1xi32>
    %7 = arith.cmpi ne, %1, %6 : vector<8x1xi32>
    %c16_i32 = arith.constant 16 : i32
    %8 = vector.broadcast %c16_i32 : i32 to vector<8x1xi32>
    %9 = arith.cmpi slt, %5, %8 : vector<8x1xi32>
    %10 = arith.andi %7, %9 : vector<8x1xi1>
    %cst = arith.constant dense<0xFF800000> : vector<8xf32>
    %11 = vector.multi_reduction <maximumf>, %0, %cst [1] : vector<8x32xf32> to vector<8xf32>
    %12 = vector.shape_cast %11 : vector<8xf32> to vector<8x1xf32>
    %13 = tpu.iota {dimensions = array<i32: 1>} : vector<1x32xi32>
    %14 = vector.broadcast %13 : vector<1x32xi32> to vector<8x32xi32>
    %15 = vector.broadcast %1 : vector<8x1xi32> to vector<8x32xi32>
    %16 = arith.cmpi eq, %14, %15 : vector<8x32xi32>
    %cst_3 = arith.constant 0.000000e+00 : f32
    %17 = vector.broadcast %cst_3 : f32 to vector<8x32xf32>
    %18 = arith.select %16, %0, %17 : vector<8x32xi1>, vector<8x32xf32>
    %cst_4 = arith.constant dense<0.000000e+00> : vector<8xf32>
    %19 = vector.multi_reduction <add>, %18, %cst_4 [1] : vector<8x32xf32> to vector<8xf32>
    %20 = vector.shape_cast %19 : vector<8xf32> to vector<8x1xf32>
    %21 = vector.broadcast %12 : vector<8x1xf32> to vector<8x32xf32>
    %22 = arith.subf %0, %21 : vector<8x32xf32>
    %23 = math.exp %22 : vector<8x32xf32>
    %cst_5 = arith.constant dense<0.000000e+00> : vector<8xf32>
    %24 = vector.multi_reduction <add>, %23, %cst_5 [1] : vector<8x32xf32> to vector<8xf32>
    %25 = vector.shape_cast %24 : vector<8xf32> to vector<8x1xf32>
    %26 = math.log %25 : vector<8x1xf32>
    %27 = arith.addf %26, %12 : vector<8x1xf32>
    %28 = arith.subf %27, %20 : vector<8x1xf32>
    %cst_6 = arith.constant 0.000000e+00 : f32
    %29 = vector.broadcast %cst_6 : f32 to vector<8x1xf32>
    %30 = arith.select %10, %28, %29 : vector<8x1xi1>, vector<8x1xf32>
    %cst_7 = arith.constant dense<0.000000e+00> : vector<1xf32>
    %31 = vector.multi_reduction <add>, %30, %cst_7 [0] : vector<8x1xf32> to vector<1xf32>
    %32 = vector.shape_cast %31 : vector<1xf32> to vector<1x1xf32>
    %33 = vector.shape_cast %32 : vector<1x1xf32> to vector<1x1x1xf32>
    %34 = vector.shape_cast %33 : vector<1x1x1xf32> to vector<1x1x1xf32>
    %35 = vector.broadcast %34 : vector<1x1x1xf32> to vector<1x1x128xf32>
    %c0_8 = arith.constant 0 : index
    %c0_9 = arith.constant 0 : index
    %c0_10 = arith.constant 0 : index
    %36 = vector.load %arg3[%c0_8, %c0_9, %c0_10] : memref<1x1x128xf32, #tpu.memory_space<vmem>>, vector<1x1x128xf32>
    tpu.vector_store %arg3[%c0_8, %c0_9, %c0_10], %35 {strides = array<i32>} : memref<1x1x128xf32, #tpu.memory_space<vmem>>, vector<1x1x128xf32>,
    return
  }
  func.func @transform_0(%arg0: i32) -> (i32, i32) {
    %c0_i32 = arith.constant 0 : i32
    %c0_i32_0 = arith.constant 0 : i32
    return %arg0, %c0_i32 : i32, i32
  }
  func.func @transform_1(%arg0: i32) -> (i32, i32) {
    %c0_i32 = arith.constant 0 : i32
    %c0_i32_0 = arith.constant 0 : i32
    return %arg0, %c0_i32 : i32, i32
  }
  func.func @transform_2(%arg0: i32) -> (i32, i32, i32) {
    %c0_i32 = arith.constant 0 : i32
    %c0_i32_0 = arith.constant 0 : i32
    %c0_i32_1 = arith.constant 0 : i32
    return %arg0, %c0_i32, %c0_i32_0 : i32, i32, i32
  }
}

</mosaic_0001>

<bundles_post_ra>
// kernel: tpu_custom_call.1
= control target key start
LH: loop header
LB: loop body
LE: loop exit
PB: predicated region body
PF: predicated region fallthrough
CT: control target
= control target key end

     0   :  { %7 = vsyncpa [#allocation3], 0  ;;  %s528_s0 = inlined_call_operand.vmem [shape: f32[16,32], index: 0, kind: input, shape index: {}]   ;;  %s529_s1 = inlined_call_operand.vmem [shape: s32[16,1], index: 1, kind: input, shape index: {}]   ;;  %s530_s2 = inlined_call_operand.hbm [shape: f32[2,1,128], index: 2, kind: output, shape index: {}]  }
   0x1   :  { %9 = vsyncpa [#allocation3 + $0x1], 0  ;;  %s421_s9 = smov 0   ;;  %s423_s10 = smov 0  }
   0x2   :  { %s425_s11 = smov 0   ;;  %s427_s12 = smov 0  }
   0x3 LB: > { %s442_s13 = sadd.s32 4294967295, %s402_s12   ;;  %s284_s14 = sadd.s32 4294967294, %s402_s12   ;;  %s402_s12 = sphi %s427_s12, %s536_s12   ;;  %s398_s11 = sphi %s425_s11, %s535_s11   ;;  %s394_s10 = sphi %s423_s10, %s534_s10   ;;  %s390_s9 = sphi %s421_s9, %s533_s9  }
   0x4   : > { %s446_s15 = sadd.s32 1, %s402_s12   ;;  %s74_s16 = sadd.s32 1, %s398_s11 }
   0x5   : > { %s71_s17 = ssub.s32 %s402_s12, %s446_s15  ;;  %p84_p0 = scmp.ne.s32.totalorder %s398_s11, %s394_s10 }
   0x6   : > { %p72_p1 = scmp.eq.s32.totalorder %s71_s17, 0  ;;  %p85_p2 = scmp.eq.s32.totalorder %s442_s13, 1 }
   0x7   : > { %p90_p3 = scmp.ne.s32.totalorder %s394_s10, %s390_s9  ;;  %p91_p4 = scmp.eq.s32.totalorder %s284_s14, 1 }
   0x8   : > { %s457_s18 = scalar_select %p72_p1, %s398_s11, %s74_s16  }
   0x9   : > { %p459_p5 = por %p85_p2, %p84_p0  ;;  %p463_p6 = por %p91_p4, %p90_p3 }
   0xa   : > { %p287_p7 = scmp.ge.s32.totalorder %s402_s12, 1  ;;  %p123_p8 = scmp.lt.s32.totalorder %s402_s12, 3 }
   0xc   : > { %p124_p9 = pnand %p287_p7, %p123_p8 }
   0xd   : > { %p147_p10 = scmp.lt.s32.totalorder (!%p124_p9), %s442_s13, 1  ;;  %v404_v0 = vmov (!%p124_p9), 0   ;;  %vm165_vm0 = vcmask (!%p124_p9), 261120   ;;  %v158_v7 = vlaneseq (!%p124_p9)  ;;  %s290_s29 = sshll.u32 (!%p124_p9), %s442_s13, 3  ;;  %vm190_vm5 = vcmask (!%p124_p9), 7168  }
   0xe   : > { %127 = sbr.rel (%p124_p9) target bundleno = 500 (0x1f4), region = 28  ;;  %334 = vset.pattern.permute.xlu0 (!%p124_p9), %v404_v0  ;;  %335 = vset.pattern.permute.xlu1 (!%p124_p9), %v404_v0  ;;  %v160_v15 = vstv (!%p124_p9), %s290_s29  ;;  %s145_s30 = sand.u32 (!%p124_p9), 1, %s394_s10  }
   0xf   : > { %v170_v8 = vand.u32 (!%p124_p9), 127, %v158_v7  ;;  %v159_v14 = vshrl.u32 (!%p124_p9), %v158_v7, 7  ;;  %s146_s3 = scalar_lea.vmem (!%p124_p9), [#allocation2], %s145_s30  ;;  %s291_s5 = sshll.u32 (!%p124_p9), %s442_s13, 4 }
  0x10   : > { %s217_s4 = sshll.u32 (!%p124_p9), %s146_s3, 4  ;;  %s488_s8 = scalar_lea.hbm (!%p124_p9), %s530_s2, %s291_s5  ;;  %s483_s4 = int_to_ptr.vmem [resolvable:$true] %s217_s4 }
  0x11   : > { %v161_v16 = vadd.s32 (!%p124_p9), %v160_v15, %v159_v14  ;;  %s205_s14 = scalar_lea.sflag (!%p124_p9), [#allocation3], %s145_s30  ;;  %s340_s16 = scalar_lea.vmem (!%p124_p9), %s483_s4, 16 }
  0x12   : > { %p341_p11 = scmp.ne.s32.totalorder (!%p124_p9), %s483_s4, %s340_s16  ;;  %s405_s17 = smov (!%p124_p9), [#allocation2]  }
  0x13   : > { %vm163_vm3 = vcmp.lt.s32.totalorder (!%p124_p9), %v161_v16, 16 }
  0x14   : > { %p342_p12 = pnand (!%p124_p9), %p341_p11, %p459_p5 }
  0x15   : > { %s148_s21 = scalar_select %p147_p10, %s442_s13, 1 }
  0x16   : > { %p343_p13 = pneg %p342_p12  ;;  %s344_s13 = sshll.u32 %s405_s17, 4  ;;  %s345_s13 = int_to_ptr.vmem [resolvable:$false] %s344_s13 }
  0x17   : > { %s288_s22 = sshll.u32 %s148_s21, 3  ;;  %s346_s21 = scalar_lea.vmem %s345_s13, 32 }
  0x18   : > { %s150_s25 = scalar_lea.vmem %s528_s0, %s288_s22  ;;  %s154_s28 = scalar_lea.vmem %s529_s1, %s288_s22 }
  0x19   : > { %v155_v1 = vld [vmem:[%s150_s25] sm:$0xff]  ;;  %p347_p0 = scmp.lt.s32.totalorder %s483_s4, %s345_s13  ;;  %p348_p1 = scmp.lt.s32.totalorder %s346_s21, %s340_s16 }
  0x1a   : > { %v166_v2 = vsel %vm165_vm0, %v155_v1, -inf  ;;  %v156_v3 = vld [vmem:[%s154_s28] sm:$0xff] }
  0x1b   : > { %167 = vmax.xlane.f32.xlu0 %v166_v2  ;;  %vm162_vm2 = vcmp.ne.s32.totalorder %v156_v3, 0  ;;  %p349_p2 = por %p348_p1, %p347_p0 }
  0x1c   : > { %vm164_vm4 = vmand %vm162_vm2, %vm163_vm3 }
  0x1d   : > { %p350_p3 = pnand %p349_p2, %p343_p13 }
  0x31   : > { %172 = vperm.xlu0 %334, %v156_v3  }
  0xa8   : > { %v168_v4 = vpop.xlane.xlu0 %167 }
  0xa9   : > { %v179_v5 = vsub.f32 %v155_v1, %v168_v4 }
  0xab   : > { %v180_v6 = vmul.f32 1.442695, %v179_v5 }
  0xad   : > { %336 = vpow2.f32 %v180_v6 }
  0xb0   : > { %v173_v9 = vpop.permute.xlu0 %172 }
  0xb1   : > { %vm174_vm1 = vcmp.eq.s32.totalorder %v170_v8, %v173_v9 }
  0xb2   : > { %v175_v11 = vsel %vm174_vm1, %v155_v1, 0.0 }
  0xb3   : > { %v176_v13 = vsel %vm165_vm0, %v175_v11, 0.0 }
  0xb7   : > { %v337_v10 = vpop.eup %336 }
  0xb8   : > { %v182_v12 = vsel %vm165_vm0, %v337_v10, 0.0 }
  0xb9   : > { %183 = vadd.xlane.f32.xlu1 %v182_v12 }
  0xbd   : > { %177 = vadd.xlane.f32.xlu1 %v176_v13 }
 0x146   : > { %v184_v17 = vpop.xlane.xlu1 %183 }
 0x147   : > { %338 = vlog2.f32 %v184_v17 }
 0x14a   : > { %v178_v20 = vpop.xlane.xlu1 %177 }
 0x151   : > { %v339_v18 = vpop.eup %338 }
 0x152   : > { %v186_v19 = vmul.f32 0.6931472, %v339_v18 }
 0x154   : > { %v187_v21 = vadd.f32 %v186_v19, %v168_v4 }
 0x156   : > { %v188_v22 = vsub.f32 %v187_v21, %v178_v20 }
 0x158   : > { %v189_v23 = vsel %vm164_vm4, %v188_v22, 0.0 }
 0x159   : > { %v191_v24 = vsel %vm190_vm5, %v189_v23, 0.0 }
 0x15a   : > { %v192_v25 = vrot.slane %v191_v24, 4 }
 0x15c   : > { %v193_v26 = vadd.f32 %v192_v25, %v191_v24 }
 0x15e   : > { %v194_v27 = vrot.slane %v193_v26, 2 }
 0x160   : > { %v195_v28 = vadd.f32 %v194_v27, %v193_v26 }
 0x162   : > { %v196_v29 = vrot.slane %v195_v28, 1 }
 0x164   : > { %v197_v30 = vadd.f32 %v196_v29, %v195_v28 }
 0x166   : > { %200 = vperm.xlu1 %335, %v197_v30  }
 0x1e5   : > { %v201_v31 = vpop.permute.xlu1 %200 }
 0x1e6   : > { %203 = vst [vmem:[%s146_s3] sm:$0x1] %v201_v31 }
 0x1e7   : > { %353 = shalt.err (!%p350_p3)
}
 0x1e8   : > { %s354_s22 = scalar_lea.hbm %s488_s8, 16  ;;  %s358_s25 = scalar_lea.hbm %s530_s2, 32 }
 0x1e9   : > { %p355_p4 = scmp.ne.s32.totalorder %s488_s8, %s354_s22  ;;  %p359_p9 = scmp.lt.u32.totalorder %s488_s8, %s530_s2 }
 0x1ea   : > { %p360_p10 = scmp.lt.u32.totalorder %s358_s25, %s354_s22  ;;  %p362_p12 = scmp.lt.u32.totalorder %s354_s22, %s488_s8 }
 0x1eb   : > { %p356_p7 = pnand %p355_p4, %p459_p5 }
 0x1ec   : > { %p361_p11 = por %p360_p10, %p359_p9 }
 0x1ed   : > { %p357_p8 = pneg %p356_p7 }
 0x1ee   : > { %p363_p13 = por %p362_p12, %p361_p11 }
 0x1f0   : > { %p364_p0 = pnand %p363_p13, %p357_p8 }
 0x1f2   : > { %367 = shalt.err (!%p364_p0)
}
 0x1f3   : > { %294 = dma.vmem_to_hbm [thread:$0]  (%p459_p5), %s483_s4, 16, %s488_s8, %s205_s14  }
 0x1f4 PF: > { %p300_p1 = scmp.ge.s32.totalorder %s402_s12, 2  ;;  %s229_s28 = sand.u32 1, %s390_s9  }
 0x1f5   : > { %s230_s29 = scalar_lea.sflag [#allocation3], %s229_s28 }
 0x1f6   : > { %p297_p2 = pnand %p300_p1, %p463_p6 }
 0x1f8   : > { %385 = dma.done.wait (!%p297_p2), %s230_s29, 16  }
 0x1f9   : > { %387 = vsyncadd (!%p297_p2), %s230_s29, 4294967280  ;;  %p12_p3 = scmp.ge.s32.totalorder %s446_s15, 4   ;;  %s533_s9 = smov %s394_s10 }
 0x1fa   : > { %s534_s10 = smov %s398_s11  ;;  %s535_s11 = smov %s457_s18 }
 0x1fb   : > { %s536_s12 = smov %s446_s15  ;;  %14 = sbr.rel (!%p12_p3) target bundleno = 3 (0x3), region = 66 }
 0x202   :  { %234 = vsyncpa [#allocation3], 1 }
 0x203   :  { %236 = vsyncpa [#allocation3 + $0x1], 1 }

</bundles_post_ra>
